<compile_context>
chip_gen: v7x
topology: tpu7x:2x2x1
jax: 0.10.0
libtpu: 0.0.40
codegen_flags: <defaults>
</compile_context>

<pallas_src>
import functools

import jax
import jax.numpy as jnp
from jax import lax
from jax.experimental import pallas as pl
from jax.experimental.pallas import tpu as pltpu


def _round_up(x, m):
    return (x + m - 1) // m * m


def _pick_batch_block(n):
    """Largest divisor of n (<=8) that still leaves >= 2 grid steps."""
    best = 1
    for d in range(1, n + 1):
        if n % d == 0 and d <= 8 and n // d >= 2:
            best = d
    return best


def _bottleneck_kernel(x_ref, w1_ref, b1_ref, w2_ref, b2_ref, w3_ref, b3_ref,
                       o_ref, pad_ref, *, B, W, HW, r, align):
    C = w1_ref.shape[0]
    halo = r * W + r

    # ---- per-lane column index & W-edge wrap masks (hoisted out of tap loop) --
    col = lax.broadcasted_iota(jnp.int32, (1, HW), 1) % W
    mask_lo = col >= r              # taps shifted by dx = -r  (kx == 0)
    mask_hi = col <= W - 1 - r      # taps shifted by dx = +r  (kx == 2)

    # ---- zero only the halo lanes (the interior is fully overwritten per
    #      image; per-step so it is correct per-TensorCore scratch) ------------
    pad_ref[:, :align] = jnp.zeros((C, align), dtype=pad_ref.dtype)
    pad_ref[:, align + HW:] = jnp.zeros((C, halo), dtype=pad_ref.dtype)

    w1 = w1_ref[...]
    w3 = w3_ref[...]
    b1 = b1_ref[...]
    b2 = b2_ref[...]
    b3 = b3_ref[...]
    w2_taps = [w2_ref[t] for t in range(9)]
    base = align - halo

    for b in range(B):
        # -- stage 1: 1x1 conv (+folded BN) + ReLU: (C,HW) = (C,Cin)@(Cin,HW) --
        y1 = jnp.dot(w1, x_ref[b], preferred_element_type=jnp.float32)
        y1 = jnp.maximum(y1 + b1, 0.0)
        # 128-aligned interior store into the zero-padded flat scratch.
        pad_ref[:, align:align + HW] = y1.astype(pad_ref.dtype)

        # -- stage 2: dilated 3x3 conv (+folded BN) + ReLU, as nine accumulated
        #    (C,C)@(C,HW) matmuls over static lane-slices (no im2col concat) ---
        y2 = jnp.zeros((C, HW), jnp.float32)
        for ky in range(3):
            for kx in range(3):
                off = base + ky * r * W + kx * r
                t = pad_ref[:, off:off + HW]
                if kx == 0:
                    t = jnp.where(mask_lo, t, 0.0)
                elif kx == 2:
                    t = jnp.where(mask_hi, t, 0.0)
                y2 = y2 + jnp.dot(w2_taps[ky * 3 + kx], t,
                                  preferred_element_type=jnp.float32)
        y2 = jnp.maximum(y2 + b2, 0.0)

        # -- stage 3: 1x1 conv (+folded BN), then final ReLU --------------------
        y3 = jnp.dot(w3, y2.astype(w3.dtype), preferred_element_type=jnp.float32)
        y3 = jnp.maximum(y3 + b3, 0.0)
        o_ref[b] = y3.astype(o_ref.dtype)


def bottleneck_forward(x_nchw, params, rate, *, eps=1e-5,
                       compute_dtype=jnp.bfloat16, batch_block=None):
    """Fused Bottleneck forward. x_nchw: (N, Cin, H, W) -> (N, C, H, W)."""
    N, Cin, H, W = x_nchw.shape
    C = params["w1"].shape[0]
    HW = H * W
    r = int(rate)
    halo = r * W + r
    align = _round_up(halo, 128)          # lane-aligned offset of the interior
    L = align + HW + halo                 # flat zero-padded scratch length

    B = batch_block if batch_block is not None else _pick_batch_block(N)
    assert N % B == 0

    f32 = jnp.float32
    cdt = compute_dtype

    # ---- fold eval-mode BN (+ conv bias) into per-channel affine (in f32) ----
    s1 = params["g1"] / jnp.sqrt(params["v1"] + eps)
    w1 = (s1[:, None] * params["w1"]).astype(cdt)                       # (C, Cin)
    b1 = ((params["b1"] - params["m1"]) * s1 + params["be1"]).reshape(C, 1).astype(f32)

    s2 = params["g2"] / jnp.sqrt(params["v2"] + eps)
    w2 = s2[:, None, None, None] * params["w2"]                         # (C, C, 3, 3)
    # per-tap layout: w2t[ky*3+kx, o, ci] = w2[o, ci, ky, kx]
    w2 = jnp.transpose(w2, (2, 3, 0, 1)).reshape(9, C, C).astype(cdt)
    b2 = (params["be2"] - params["m2"] * s2).reshape(C, 1).astype(f32)

    s3 = params["g3"] / jnp.sqrt(params["v3"] + eps)
    w3 = (s3[:, None] * params["w3"]).astype(cdt)                       # (C, C)
    b3 = ((params["b3"] - params["m3"]) * s3 + params["be3"]).reshape(C, 1).astype(f32)

    x_flat = x_nchw.reshape(N, Cin, HW).astype(cdt)      # free reshape (+ cast)

    kernel = functools.partial(_bottleneck_kernel,
                               B=B, W=W, HW=HW, r=r, align=align)

    # Rough per-step working set -> raise the scoped VMEM limit when needed.
    isz_c = jnp.dtype(cdt).itemsize
    isz_o = jnp.dtype(x_nchw.dtype).itemsize
    est = (2 * B * Cin * HW * isz_c                       # double-buffered x
           + 2 * B * C * HW * isz_o                       # double-buffered out
           + 2 * (C * Cin + 10 * C * C) * isz_c + 6 * C * 4   # weights/biases
           + C * L * isz_c                                # pad scratch
           + 4 * C * HW * 4)                              # f32 in-kernel temps
    vmem_limit = int(min(100 * 2**20, max(32 * 2**20, int(1.5 * est))))

    out_flat = pl.pallas_call(
        kernel,
        out_shape=jax.ShapeDtypeStruct((N, C, HW), x_nchw.dtype),
        grid_spec=pltpu.PrefetchScalarGridSpec(
            num_scalar_prefetch=0,
            grid=(N // B,),
            in_specs=[
                pl.BlockSpec((B, Cin, HW), lambda n: (n, 0, 0)),  # activations
                pl.BlockSpec((C, Cin), lambda n: (0, 0)),         # w1 (BN folded)
                pl.BlockSpec((C, 1), lambda n: (0, 0)),           # b1
                pl.BlockSpec((9, C, C), lambda n: (0, 0, 0)),     # w2 per-tap
                pl.BlockSpec((C, 1), lambda n: (0, 0)),           # b2
                pl.BlockSpec((C, C), lambda n: (0, 0)),           # w3 (BN folded)
                pl.BlockSpec((C, 1), lambda n: (0, 0)),           # b3
            ],
            out_specs=pl.BlockSpec((B, C, HW), lambda n: (n, 0, 0)),
            scratch_shapes=[pltpu.VMEM((C, L), cdt)],
        ),
        compiler_params=pltpu.CompilerParams(
            dimension_semantics=("parallel",),
            vmem_limit_bytes=vmem_limit),
    )(x_flat, w1, b1, w2, b2, w3, b3)

    return out_flat.reshape(N, C, H, W)


def bottleneck_reference(x, p, rate, eps=1e-5):
    """Pure-JAX reference (XLA convs), eval-mode BN, NCHW."""
    dn = ("NCHW", "OIHW", "NCHW")
    hp = lax.Precision.HIGHEST

    def bn(y, g, b, m, v):
        inv = g / jnp.sqrt(v + eps)
        return (y - m[None, :, None, None]) * inv[None, :, None, None] \
            + b[None, :, None, None]

    y = lax.conv_general_dilated(x, p["w1"][:, :, None, None], (1, 1), "VALID",
                                 dimension_numbers=dn, precision=hp)
    y = y + p["b1"][None, :, None, None]
    y = jax.nn.relu(bn(y, p["g1"], p["be1"], p["m1"], p["v1"]))

    y = lax.conv_general_dilated(y, p["w2"], (1, 1), [(rate, rate), (rate, rate)],
                                 rhs_dilation=(rate, rate), dimension_numbers=dn,
                                 precision=hp)
    y = jax.nn.relu(bn(y, p["g2"], p["be2"], p["m2"], p["v2"]))

    y = lax.conv_general_dilated(y, p["w3"][:, :, None, None], (1, 1), "VALID",
                                 dimension_numbers=dn, precision=hp)
    y = y + p["b3"][None, :, None, None]
    y = bn(y, p["g3"], p["be3"], p["m3"], p["v3"])
    return jax.nn.relu(y)


if __name__ == "__main__":
    key = jax.random.PRNGKey(0)
    in_chan, out_chan = 4, 8
    H = W = 16
    ks = jax.random.split(key, 19)

    def normal(k, shape, scale=1.0):
        return scale * jax.random.normal(k, shape, jnp.float32)

    def uniform(k, shape):
        return jax.random.uniform(k, shape, jnp.float32, 0.5, 1.5)

    C = out_chan
    params = dict(
        # conv1: Conv2d(in, out, 1, bias=True) + BN
        w1=normal(ks[1], (C, in_chan), 0.3), b1=normal(ks[2], (C,), 0.1),
        g1=uniform(ks[3], (C,)), be1=normal(ks[4], (C,), 0.1),
        m1=normal(ks[5], (C,), 0.1), v1=uniform(ks[6], (C,)),
        # dilat: Conv2d(out, out, 3, padding=rate, dilation=rate, bias=False) + BN
        w2=normal(ks[7], (C, C, 3, 3), 0.2),
        g2=uniform(ks[8], (C,)), be2=normal(ks[9], (C,), 0.1),
        m2=normal(ks[10], (C,), 0.1), v2=uniform(ks[11], (C,)),
        # conv2: Conv2d(out, out, 1, bias=True) + BN
        w3=normal(ks[12], (C, C), 0.3), b3=normal(ks[13], (C,), 0.1),
        g3=uniform(ks[14], (C,)), be3=normal(ks[15], (C,), 0.1),
        m3=normal(ks[16], (C,), 0.1), v3=uniform(ks[17], (C,)),
    )

    # --- run 1: f32 matmuls (tight accuracy check), rate=2, batch=2 ---------
    x_a = normal(ks[0], (2, in_chan, H, W))
    out_a = bottleneck_forward(x_a, params, 2, compute_dtype=jnp.float32)
    jax.block_until_ready(out_a)
    assert out_a.shape == (2, out_chan, H, W)
    ref_a = bottleneck_reference(x_a, params, 2)
    err_a = float(jnp.max(jnp.abs(out_a - ref_a)))
    assert err_a < 5e-2, f"f32 run: max abs error vs reference: {err_a}"

    # --- run 2: bf16 matmuls, rate=3, batch=4 (2 images per grid step) ------
    x_b = normal(ks[18], (4, in_chan, H, W))
    out_b = bottleneck_forward(x_b, params, 3, compute_dtype=jnp.bfloat16)
    jax.block_until_ready(out_b)
    assert out_b.shape == (4, out_chan, H, W)
    ref_b = bottleneck_reference(x_b, params, 3)
    assert not bool(jnp.isnan(out_b).any())
    err_b = float(jnp.max(jnp.abs(out_b - ref_b)))
    tol_b = 0.08 * max(1.0, float(jnp.max(jnp.abs(ref_b))))
    assert err_b < tol_b, f"bf16 run: max abs error {err_b} > tol {tol_b}"

    print("KERNEL_OK")
</pallas_src>

<mosaic_0001>
module attributes {stable_mosaic.version = 11 : i64} {
  func.func @_bottleneck_kernel(%arg0: i32, %arg1: memref<1x4x256xf32, #tpu.memory_space<vmem>>, %arg2: memref<8x4xf32, #tpu.memory_space<vmem>>, %arg3: memref<8x1xf32, #tpu.memory_space<vmem>>, %arg4: memref<9x8x8xf32, #tpu.memory_space<vmem>>, %arg5: memref<8x1xf32, #tpu.memory_space<vmem>>, %arg6: memref<8x8xf32, #tpu.memory_space<vmem>>, %arg7: memref<8x1xf32, #tpu.memory_space<vmem>>, %arg8: memref<1x8x256xf32, #tpu.memory_space<vmem>>, %arg9: memref<8x418xf32, #tpu.memory_space<vmem>>) attributes {dimension_semantics = [#tpu.dimension_semantics<parallel>], iteration_bounds = array<i64: 2>, scalar_prefetch = 0 : i64, scratch_operands = 1 : i64, tpu.core_type = #tpu.core_type<tc>, window_params = [{transform_indices = @transform_0, window_bounds = array<i64: 1, 4, 256>}, {pipeline_mode = #tpu.pipeline_mode<synchronous>, transform_indices = @transform_1, window_bounds = array<i64: 8, 4>}, {pipeline_mode = #tpu.pipeline_mode<synchronous>, transform_indices = @transform_2, window_bounds = array<i64: 8, 1>}, {pipeline_mode = #tpu.pipeline_mode<synchronous>, transform_indices = @transform_3, window_bounds = array<i64: 9, 8, 8>}, {pipeline_mode = #tpu.pipeline_mode<synchronous>, transform_indices = @transform_4, window_bounds = array<i64: 8, 1>}, {pipeline_mode = #tpu.pipeline_mode<synchronous>, transform_indices = @transform_5, window_bounds = array<i64: 8, 8>}, {pipeline_mode = #tpu.pipeline_mode<synchronous>, transform_indices = @transform_6, window_bounds = array<i64: 8, 1>}, {transform_indices = @transform_7, window_bounds = array<i64: 1, 8, 256>}]} {
    %0 = tpu.iota {dimensions = array<i32: 1>} : vector<1x256xi32>
    %c16_i32 = arith.constant 16 : i32
    %c0_i32 = arith.constant 0 : i32
    %1 = arith.cmpi eq, %c16_i32, %c0_i32 : i32
    %c1_i32 = arith.constant 1 : i32
    %2 = arith.select %1, %c1_i32, %c16_i32 : i32
    %3 = vector.broadcast %2 : i32 to vector<1x256xi32>
    %4 = arith.remsi %0, %3 : vector<1x256xi32>
    %c0_i32_0 = arith.constant 0 : i32
    %5 = vector.broadcast %c0_i32_0 : i32 to vector<1x256xi32>
    %6 = arith.cmpi ne, %4, %5 : vector<1x256xi32>
    %c0_i32_1 = arith.constant 0 : i32
    %7 = vector.broadcast %c0_i32_1 : i32 to vector<1x256xi32>
    %8 = arith.cmpi slt, %4, %7 : vector<1x256xi32>
    %c0_i32_2 = arith.constant 0 : i32
    %9 = arith.cmpi slt, %2, %c0_i32_2 : i32
    %10 = vector.broadcast %9 : i1 to vector<1x256xi1>
    %11 = vector.broadcast %10 : vector<1x256xi1> to vector<1x256xi1>
    %12 = arith.xori %8, %11 : vector<1x256xi1>
    %13 = arith.andi %12, %6 : vector<1x256xi1>
    %14 = vector.broadcast %2 : i32 to vector<1x256xi32>
    %15 = arith.addi %4, %14 : vector<1x256xi32>
    %16 = arith.select %13, %15, %4 : vector<1x256xi1>, vector<1x256xi32>
    %c2_i32 = arith.constant 2 : i32
    %17 = vector.broadcast %c2_i32 : i32 to vector<1x256xi32>
    %18 = arith.cmpi sge, %16, %17 : vector<1x256xi32>
    %c13_i32 = arith.constant 13 : i32
    %19 = vector.broadcast %c13_i32 : i32 to vector<1x256xi32>
    %20 = arith.cmpi sle, %16, %19 : vector<1x256xi32>
    %cst = arith.constant 0.000000e+00 : f32
    %21 = vector.broadcast %cst : f32 to vector<8x128xf32>
    %c0 = arith.constant 0 : index
    %c0_3 = arith.constant 0 : index
    %22 = vector.load %arg9[%c0, %c0_3] : memref<8x418xf32, #tpu.memory_space<vmem>>, vector<8x128xf32>
    tpu.vector_store %arg9[%c0, %c0_3], %21 {strides = array<i32>} : memref<8x418xf32, #tpu.memory_space<vmem>>, vector<8x128xf32>,
    %cst_4 = arith.constant 0.000000e+00 : f32
    %23 = vector.broadcast %cst_4 : f32 to vector<8x34xf32>
    %c0_5 = arith.constant 0 : index
    %c384 = arith.constant 384 : index
    %24 = vector.load %arg9[%c0_5, %c384] : memref<8x418xf32, #tpu.memory_space<vmem>>, vector<8x34xf32>
    tpu.vector_store %arg9[%c0_5, %c384], %23 {strides = array<i32>} : memref<8x418xf32, #tpu.memory_space<vmem>>, vector<8x34xf32>,
    %c0_6 = arith.constant 0 : index
    %c0_7 = arith.constant 0 : index
    %25 = vector.load %arg2[%c0_6, %c0_7] : memref<8x4xf32, #tpu.memory_space<vmem>>, vector<8x4xf32>
    %c0_8 = arith.constant 0 : index
    %c0_9 = arith.constant 0 : index
    %26 = vector.load %arg6[%c0_8, %c0_9] : memref<8x8xf32, #tpu.memory_space<vmem>>, vector<8x8xf32>
    %c0_10 = arith.constant 0 : index
    %c0_11 = arith.constant 0 : index
    %27 = vector.load %arg3[%c0_10, %c0_11] : memref<8x1xf32, #tpu.memory_space<vmem>>, vector<8x1xf32>
    %c0_12 = arith.constant 0 : index
    %c0_13 = arith.constant 0 : index
    %28 = vector.load %arg5[%c0_12, %c0_13] : memref<8x1xf32, #tpu.memory_space<vmem>>, vector<8x1xf32>
    %c0_14 = arith.constant 0 : index
    %c0_15 = arith.constant 0 : index
    %29 = vector.load %arg7[%c0_14, %c0_15] : memref<8x1xf32, #tpu.memory_space<vmem>>, vector<8x1xf32>
    %c0_16 = arith.constant 0 : index
    %c0_17 = arith.constant 0 : index
    %c0_18 = arith.constant 0 : index
    %30 = vector.load %arg4[%c0_16, %c0_17, %c0_18] : memref<9x8x8xf32, #tpu.memory_space<vmem>>, vector<1x8x8xf32>
    %31 = vector.shape_cast %30 : vector<1x8x8xf32> to vector<8x8xf32>
    %c1 = arith.constant 1 : index
    %c0_19 = arith.constant 0 : index
    %c0_20 = arith.constant 0 : index
    %32 = vector.load %arg4[%c1, %c0_19, %c0_20] : memref<9x8x8xf32, #tpu.memory_space<vmem>>, vector<1x8x8xf32>
    %33 = vector.shape_cast %32 : vector<1x8x8xf32> to vector<8x8xf32>
    %c2 = arith.constant 2 : index
    %c0_21 = arith.constant 0 : index
    %c0_22 = arith.constant 0 : index
    %34 = vector.load %arg4[%c2, %c0_21, %c0_22] : memref<9x8x8xf32, #tpu.memory_space<vmem>>, vector<1x8x8xf32>
    %35 = vector.shape_cast %34 : vector<1x8x8xf32> to vector<8x8xf32>
    %c3 = arith.constant 3 : index
    %c0_23 = arith.constant 0 : index
    %c0_24 = arith.constant 0 : index
    %36 = vector.load %arg4[%c3, %c0_23, %c0_24] : memref<9x8x8xf32, #tpu.memory_space<vmem>>, vector<1x8x8xf32>
    %37 = vector.shape_cast %36 : vector<1x8x8xf32> to vector<8x8xf32>
    %c4 = arith.constant 4 : index
    %c0_25 = arith.constant 0 : index
    %c0_26 = arith.constant 0 : index
    %38 = vector.load %arg4[%c4, %c0_25, %c0_26] : memref<9x8x8xf32, #tpu.memory_space<vmem>>, vector<1x8x8xf32>
    %39 = vector.shape_cast %38 : vector<1x8x8xf32> to vector<8x8xf32>
    %c5 = arith.constant 5 : index
    %c0_27 = arith.constant 0 : index
    %c0_28 = arith.constant 0 : index
    %40 = vector.load %arg4[%c5, %c0_27, %c0_28] : memref<9x8x8xf32, #tpu.memory_space<vmem>>, vector<1x8x8xf32>
    %41 = vector.shape_cast %40 : vector<1x8x8xf32> to vector<8x8xf32>
    %c6 = arith.constant 6 : index
    %c0_29 = arith.constant 0 : index
    %c0_30 = arith.constant 0 : index
    %42 = vector.load %arg4[%c6, %c0_29, %c0_30] : memref<9x8x8xf32, #tpu.memory_space<vmem>>, vector<1x8x8xf32>
    %43 = vector.shape_cast %42 : vector<1x8x8xf32> to vector<8x8xf32>
    %c7 = arith.constant 7 : index
    %c0_31 = arith.constant 0 : index
    %c0_32 = arith.constant 0 : index
    %44 = vector.load %arg4[%c7, %c0_31, %c0_32] : memref<9x8x8xf32, #tpu.memory_space<vmem>>, vector<1x8x8xf32>
    %45 = vector.shape_cast %44 : vector<1x8x8xf32> to vector<8x8xf32>
    %c8 = arith.constant 8 : index
    %c0_33 = arith.constant 0 : index
    %c0_34 = arith.constant 0 : index
    %46 = vector.load %arg4[%c8, %c0_33, %c0_34] : memref<9x8x8xf32, #tpu.memory_space<vmem>>, vector<1x8x8xf32>
    %47 = vector.shape_cast %46 : vector<1x8x8xf32> to vector<8x8xf32>
    %c0_35 = arith.constant 0 : index
    %c0_36 = arith.constant 0 : index
    %c0_37 = arith.constant 0 : index
    %48 = vector.load %arg1[%c0_35, %c0_36, %c0_37] : memref<1x4x256xf32, #tpu.memory_space<vmem>>, vector<1x4x256xf32>
    %49 = vector.shape_cast %48 : vector<1x4x256xf32> to vector<4x256xf32>
    %cst_38 = arith.constant dense<0.000000e+00> : vector<8x256xf32>
    %50 = tpu.matmul %25, %49, %cst_38 {dimension_numbers = #tpu.dot_dimension_numbers<[1], [0], [0], [1], [0, 0, 1, 1], [], []>} : vector<8x4xf32>, vector<4x256xf32>, vector<8x256xf32> -> vector<8x256xf32>
    %51 = vector.broadcast %27 : vector<8x1xf32> to vector<8x256xf32>
    %52 = arith.addf %50, %51 : vector<8x256xf32>
    %cst_39 = arith.constant 0.000000e+00 : f32
    %53 = vector.broadcast %cst_39 : f32 to vector<8x256xf32>
    %54 = arith.maximumf %52, %53 : vector<8x256xf32>
    %c0_40 = arith.constant 0 : index
    %c128 = arith.constant 128 : index
    %55 = vector.load %arg9[%c0_40, %c128] : memref<8x418xf32, #tpu.memory_space<vmem>>, vector<8x256xf32>
    tpu.vector_store %arg9[%c0_40, %c128], %54 {strides = array<i32>} : memref<8x418xf32, #tpu.memory_space<vmem>>, vector<8x256xf32>,
    %cst_41 = arith.constant 0.000000e+00 : f32
    %56 = vector.broadcast %cst_41 : f32 to vector<8x256xf32>
    %c0_42 = arith.constant 0 : index
    %c94 = arith.constant 94 : index
    %57 = vector.load %arg9[%c0_42, %c94] : memref<8x418xf32, #tpu.memory_space<vmem>>, vector<8x256xf32>
    %cst_43 = arith.constant 0.000000e+00 : f32
    %58 = vector.shape_cast %18 : vector<1x256xi1> to vector<1x256xi1>
    %59 = vector.broadcast %58 : vector<1x256xi1> to vector<8x256xi1>
    %60 = vector.broadcast %cst_43 : f32 to vector<8x256xf32>
    %61 = arith.select %59, %57, %60 : vector<8x256xi1>, vector<8x256xf32>
    %cst_44 = arith.constant dense<0.000000e+00> : vector<8x256xf32>
    %62 = tpu.matmul %31, %61, %cst_44 {dimension_numbers = #tpu.dot_dimension_numbers<[1], [0], [0], [1], [0, 0, 1, 1], [], []>} : vector<8x8xf32>, vector<8x256xf32>, vector<8x256xf32> -> vector<8x256xf32>
    %63 = arith.addf %56, %62 : vector<8x256xf32>
    %c0_45 = arith.constant 0 : index
    %c96 = arith.constant 96 : index
    %64 = vector.load %arg9[%c0_45, %c96] : memref<8x418xf32, #tpu.memory_space<vmem>>, vector<8x256xf32>
    %cst_46 = arith.constant dense<0.000000e+00> : vector<8x256xf32>
    %65 = tpu.matmul %33, %64, %cst_46 {dimension_numbers = #tpu.dot_dimension_numbers<[1], [0], [0], [1], [0, 0, 1, 1], [], []>} : vector<8x8xf32>, vector<8x256xf32>, vector<8x256xf32> -> vector<8x256xf32>
    %66 = arith.addf %63, %65 : vector<8x256xf32>
    %c0_47 = arith.constant 0 : index
    %c98 = arith.constant 98 : index
    %67 = vector.load %arg9[%c0_47, %c98] : memref<8x418xf32, #tpu.memory_space<vmem>>, vector<8x256xf32>
    %cst_48 = arith.constant 0.000000e+00 : f32
    %68 = vector.shape_cast %20 : vector<1x256xi1> to vector<1x256xi1>
    %69 = vector.broadcast %68 : vector<1x256xi1> to vector<8x256xi1>
    %70 = vector.broadcast %cst_48 : f32 to vector<8x256xf32>
    %71 = arith.select %69, %67, %70 : vector<8x256xi1>, vector<8x256xf32>
    %cst_49 = arith.constant dense<0.000000e+00> : vector<8x256xf32>
    %72 = tpu.matmul %35, %71, %cst_49 {dimension_numbers = #tpu.dot_dimension_numbers<[1], [0], [0], [1], [0, 0, 1, 1], [], []>} : vector<8x8xf32>, vector<8x256xf32>, vector<8x256xf32> -> vector<8x256xf32>
    %73 = arith.addf %66, %72 : vector<8x256xf32>
    %c0_50 = arith.constant 0 : index
    %c126 = arith.constant 126 : index
    %74 = vector.load %arg9[%c0_50, %c126] : memref<8x418xf32, #tpu.memory_space<vmem>>, vector<8x256xf32>
    %cst_51 = arith.constant 0.000000e+00 : f32
    %75 = vector.shape_cast %18 : vector<1x256xi1> to vector<1x256xi1>
    %76 = vector.broadcast %75 : vector<1x256xi1> to vector<8x256xi1>
    %77 = vector.broadcast %cst_51 : f32 to vector<8x256xf32>
    %78 = arith.select %76, %74, %77 : vector<8x256xi1>, vector<8x256xf32>
    %cst_52 = arith.constant dense<0.000000e+00> : vector<8x256xf32>
    %79 = tpu.matmul %37, %78, %cst_52 {dimension_numbers = #tpu.dot_dimension_numbers<[1], [0], [0], [1], [0, 0, 1, 1], [], []>} : vector<8x8xf32>, vector<8x256xf32>, vector<8x256xf32> -> vector<8x256xf32>
    %80 = arith.addf %73, %79 : vector<8x256xf32>
    %c0_53 = arith.constant 0 : index
    %c128_54 = arith.constant 128 : index
    %81 = vector.load %arg9[%c0_53, %c128_54] : memref<8x418xf32, #tpu.memory_space<vmem>>, vector<8x256xf32>
    %cst_55 = arith.constant dense<0.000000e+00> : vector<8x256xf32>
    %82 = tpu.matmul %39, %81, %cst_55 {dimension_numbers = #tpu.dot_dimension_numbers<[1], [0], [0], [1], [0, 0, 1, 1], [], []>} : vector<8x8xf32>, vector<8x256xf32>, vector<8x256xf32> -> vector<8x256xf32>
    %83 = arith.addf %80, %82 : vector<8x256xf32>
    %c0_56 = arith.constant 0 : index
    %c130 = arith.constant 130 : index
    %84 = vector.load %arg9[%c0_56, %c130] : memref<8x418xf32, #tpu.memory_space<vmem>>, vector<8x256xf32>
    %cst_57 = arith.constant 0.000000e+00 : f32
    %85 = vector.shape_cast %20 : vector<1x256xi1> to vector<1x256xi1>
    %86 = vector.broadcast %85 : vector<1x256xi1> to vector<8x256xi1>
    %87 = vector.broadcast %cst_57 : f32 to vector<8x256xf32>
    %88 = arith.select %86, %84, %87 : vector<8x256xi1>, vector<8x256xf32>
    %cst_58 = arith.constant dense<0.000000e+00> : vector<8x256xf32>
    %89 = tpu.matmul %41, %88, %cst_58 {dimension_numbers = #tpu.dot_dimension_numbers<[1], [0], [0], [1], [0, 0, 1, 1], [], []>} : vector<8x8xf32>, vector<8x256xf32>, vector<8x256xf32> -> vector<8x256xf32>
    %90 = arith.addf %83, %89 : vector<8x256xf32>
    %c0_59 = arith.constant 0 : index
    %c158 = arith.constant 158 : index
    %91 = vector.load %arg9[%c0_59, %c158] : memref<8x418xf32, #tpu.memory_space<vmem>>, vector<8x256xf32>
    %cst_60 = arith.constant 0.000000e+00 : f32
    %92 = vector.shape_cast %18 : vector<1x256xi1> to vector<1x256xi1>
    %93 = vector.broadcast %92 : vector<1x256xi1> to vector<8x256xi1>
    %94 = vector.broadcast %cst_60 : f32 to vector<8x256xf32>
    %95 = arith.select %93, %91, %94 : vector<8x256xi1>, vector<8x256xf32>
    %cst_61 = arith.constant dense<0.000000e+00> : vector<8x256xf32>
    %96 = tpu.matmul %43, %95, %cst_61 {dimension_numbers = #tpu.dot_dimension_numbers<[1], [0], [0], [1], [0, 0, 1, 1], [], []>} : vector<8x8xf32>, vector<8x256xf32>, vector<8x256xf32> -> vector<8x256xf32>
    %97 = arith.addf %90, %96 : vector<8x256xf32>
    %c0_62 = arith.constant 0 : index
    %c160 = arith.constant 160 : index
    %98 = vector.load %arg9[%c0_62, %c160] : memref<8x418xf32, #tpu.memory_space<vmem>>, vector<8x256xf32>
    %cst_63 = arith.constant dense<0.000000e+00> : vector<8x256xf32>
    %99 = tpu.matmul %45, %98, %cst_63 {dimension_numbers = #tpu.dot_dimension_numbers<[1], [0], [0], [1], [0, 0, 1, 1], [], []>} : vector<8x8xf32>, vector<8x256xf32>, vector<8x256xf32> -> vector<8x256xf32>
    %100 = arith.addf %97, %99 : vector<8x256xf32>
    %c0_64 = arith.constant 0 : index
    %c162 = arith.constant 162 : index
    %101 = vector.load %arg9[%c0_64, %c162] : memref<8x418xf32, #tpu.memory_space<vmem>>, vector<8x256xf32>
    %cst_65 = arith.constant 0.000000e+00 : f32
    %102 = vector.shape_cast %20 : vector<1x256xi1> to vector<1x256xi1>
    %103 = vector.broadcast %102 : vector<1x256xi1> to vector<8x256xi1>
    %104 = vector.broadcast %cst_65 : f32 to vector<8x256xf32>
    %105 = arith.select %103, %101, %104 : vector<8x256xi1>, vector<8x256xf32>
    %cst_66 = arith.constant dense<0.000000e+00> : vector<8x256xf32>
    %106 = tpu.matmul %47, %105, %cst_66 {dimension_numbers = #tpu.dot_dimension_numbers<[1], [0], [0], [1], [0, 0, 1, 1], [], []>} : vector<8x8xf32>, vector<8x256xf32>, vector<8x256xf32> -> vector<8x256xf32>
    %107 = arith.addf %100, %106 : vector<8x256xf32>
    %108 = vector.broadcast %28 : vector<8x1xf32> to vector<8x256xf32>
    %109 = arith.addf %107, %108 : vector<8x256xf32>
    %cst_67 = arith.constant 0.000000e+00 : f32
    %110 = vector.broadcast %cst_67 : f32 to vector<8x256xf32>
    %111 = arith.maximumf %109, %110 : vector<8x256xf32>
    %cst_68 = arith.constant dense<0.000000e+00> : vector<8x256xf32>
    %112 = tpu.matmul %26, %111, %cst_68 {dimension_numbers = #tpu.dot_dimension_numbers<[1], [0], [0], [1], [0, 0, 1, 1], [], []>} : vector<8x8xf32>, vector<8x256xf32>, vector<8x256xf32> -> vector<8x256xf32>
    %113 = vector.broadcast %29 : vector<8x1xf32> to vector<8x256xf32>
    %114 = arith.addf %112, %113 : vector<8x256xf32>
    %cst_69 = arith.constant 0.000000e+00 : f32
    %115 = vector.broadcast %cst_69 : f32 to vector<8x256xf32>
    %116 = arith.maximumf %114, %115 : vector<8x256xf32>
    %c0_70 = arith.constant 0 : index
    %c0_71 = arith.constant 0 : index
    %c0_72 = arith.constant 0 : index
    %117 = vector.load %arg8[%c0_70, %c0_71, %c0_72] : memref<1x8x256xf32, #tpu.memory_space<vmem>>, vector<1x8x256xf32>
    %118 = vector.shape_cast %117 : vector<1x8x256xf32> to vector<8x256xf32>
    %119 = vector.shape_cast %116 : vector<8x256xf32> to vector<1x8x256xf32>
    tpu.vector_store %arg8[%c0_70, %c0_71, %c0_72], %119 {strides = array<i32>} : memref<1x8x256xf32, #tpu.memory_space<vmem>>, vector<1x8x256xf32>,
    return
  }
  func.func @transform_0(%arg0: i32) -> (i32, i32, i32) {
    %c0_i32 = arith.constant 0 : i32
    %c0_i32_0 = arith.constant 0 : i32
    %c0_i32_1 = arith.constant 0 : i32
    return %arg0, %c0_i32, %c0_i32_0 : i32, i32, i32
  }
  func.func @transform_1(%arg0: i32) -> (i32, i32) {
    %c0_i32 = arith.constant 0 : i32
    %c0_i32_0 = arith.constant 0 : i32
    %c0_i32_1 = arith.constant 0 : i32
    return %c0_i32, %c0_i32_0 : i32, i32
  }
  func.func @transform_2(%arg0: i32) -> (i32, i32) {
    %c0_i32 = arith.constant 0 : i32
    %c0_i32_0 = arith.constant 0 : i32
    %c0_i32_1 = arith.constant 0 : i32
    return %c0_i32, %c0_i32_0 : i32, i32
  }
  func.func @transform_3(%arg0: i32) -> (i32, i32, i32) {
    %c0_i32 = arith.constant 0 : i32
    %c0_i32_0 = arith.constant 0 : i32
    %c0_i32_1 = arith.constant 0 : i32
    %c0_i32_2 = arith.constant 0 : i32
    return %c0_i32, %c0_i32_0, %c0_i32_1 : i32, i32, i32
  }
  func.func @transform_4(%arg0: i32) -> (i32, i32) {
    %c0_i32 = arith.constant 0 : i32
    %c0_i32_0 = arith.constant 0 : i32
    %c0_i32_1 = arith.constant 0 : i32
    return %c0_i32, %c0_i32_0 : i32, i32
  }
  func.func @transform_5(%arg0: i32) -> (i32, i32) {
    %c0_i32 = arith.constant 0 : i32
    %c0_i32_0 = arith.constant 0 : i32
    %c0_i32_1 = arith.constant 0 : i32
    return %c0_i32, %c0_i32_0 : i32, i32
  }
  func.func @transform_6(%arg0: i32) -> (i32, i32) {
    %c0_i32 = arith.constant 0 : i32
    %c0_i32_0 = arith.constant 0 : i32
    %c0_i32_1 = arith.constant 0 : i32
    return %c0_i32, %c0_i32_0 : i32, i32
  }
  func.func @transform_7(%arg0: i32) -> (i32, i32, i32) {
    %c0_i32 = arith.constant 0 : i32
    %c0_i32_0 = arith.constant 0 : i32
    %c0_i32_1 = arith.constant 0 : i32
    return %arg0, %c0_i32, %c0_i32_0 : i32, i32, i32
  }
}

</mosaic_0001>

<bundles_post_ra>
// kernel: tpu_custom_call.1
= control target key start
LH: loop header
LB: loop body
LE: loop exit
PB: predicated region body
PF: predicated region fallthrough
CT: control target
= control target key end

     0   :  { %12 = vsyncpa [#allocation4], 0  ;;  %s1832_s0 = inlined_call_operand.vmem [shape: f32[2,4,256], index: 0, kind: input, shape index: {}]   ;;  %s1833_s1 = inlined_call_operand.vmem [shape: f32[8,4], index: 1, kind: input, shape index: {}]   ;;  %s1834_s2 = inlined_call_operand.vmem [shape: f32[8,1], index: 2, kind: input, shape index: {}]   ;;  %s1835_s3 = inlined_call_operand.vmem [shape: f32[9,8,8], index: 3, kind: input, shape index: {}]   ;;  %s1836_s4 = inlined_call_operand.vmem [shape: f32[8,1], index: 4, kind: input, shape index: {}]   ;;  %s1837_s5 = inlined_call_operand.vmem [shape: f32[8,8], index: 5, kind: input, shape index: {}]   ;;  %s1838_s6 = inlined_call_operand.vmem [shape: f32[8,1], index: 6, kind: input, shape index: {}]   ;;  %s1839_s7 = inlined_call_operand.hbm [shape: f32[2,8,256], index: 7, kind: output, shape index: {}]  }
   0x1   :  { %14 = vsyncpa [#allocation4 + $0x1], 0  ;;  %s1621_s24 = smov 0   ;;  %s1623_s25 = smov 0  }
   0x2   :  { %s1625_s26 = smov 0   ;;  %s1627_s27 = smov 0  }
   0x3 LB: > { %s1642_s28 = sadd.s32 4294967295, %s1568_s27   ;;  %s1391_s29 = sadd.s32 4294967294, %s1568_s27   ;;  %s1568_s27 = sphi %s1627_s27, %s1853_s27   ;;  %s1564_s26 = sphi %s1625_s26, %s1852_s26   ;;  %s1560_s25 = sphi %s1623_s25, %s1851_s25   ;;  %s1556_s24 = sphi %s1621_s24, %s1850_s24  }
   0x4   : > { %s1646_s30 = sadd.s32 1, %s1568_s27   ;;  %s179_s8 = sadd.s32 1, %s1564_s26 }
   0x5   : > { %s176_s9 = ssub.s32 %s1568_s27, %s1646_s30  ;;  %p189_p0 = scmp.ne.s32.totalorder %s1564_s26, %s1560_s25 }
   0x6   : > { %p177_p1 = scmp.eq.s32.totalorder %s176_s9, 0  ;;  %p190_p2 = scmp.eq.s32.totalorder %s1642_s28, 1 }
   0x7   : > { %p195_p3 = scmp.ne.s32.totalorder %s1560_s25, %s1556_s24  ;;  %p196_p4 = scmp.eq.s32.totalorder %s1391_s29, 1 }
   0x8   : > { %s1657_s10 = scalar_select %p177_p1, %s1564_s26, %s179_s8  }
   0x9   : > { %p1659_p5 = por %p190_p2, %p189_p0  ;;  %p1663_p6 = por %p196_p4, %p195_p3 }
   0xa   : > { %p1394_p7 = scmp.ge.s32.totalorder %s1568_s27, 1  ;;  %p240_p8 = scmp.lt.s32.totalorder %s1568_s27, 3 }
   0xc   : > { %p241_p9 = pnand %p1394_p7, %p240_p8 }
   0xd   : > { %p272_p10 = scmp.lt.s32.totalorder (!%p241_p9), %s1642_s28, 1  ;;  %v1570_v0 = vmov (!%p241_p9), 0.0   ;;  %v1571_v1 = vmov (!%p241_p9), 0   ;;  %v313_v2 = vld [vmem:[%s1834_s2] sm:$0xff] (!%p241_p9)  ;;  %vm345_vm0 = vcmask (!%p241_p9), 1043456   ;;  %vm341_vm1 = vcmask (!%p241_p9), 31744  }
   0xe   : > { %244 = sbr.rel (%p241_p9) target bundleno = 860 (0x35c), region = 48  ;;  %414 = vmatprep.mubr.f32.mxu0 (!%p241_p9), %v1570_v0  ;;  %1503 = vset.pattern.permute.xlu0 (!%p241_p9), %v1571_v1  ;;  %v311_v5 = vld [vmem:[%s1833_s1] sm:$0xff] (!%p241_p9)  ;;  %vm309_vm2 = vcmask (!%p241_p9), 277504   ;;  %s1572_s22 = smov (!%p241_p9), 2   ;;  %v277_v16 = vlaneseq (!%p241_p9)  ;;  %vm706_vm3 = vcmask (!%p241_p9), 15360   ;;  %v1400_v28 = vld [vmem:[%s1835_s3 + $0x18] sm:$0xff] (!%p241_p9) }
   0xf   : > { %336 = vperm.xlu0 (!%p241_p9), %1503, %v313_v2   ;;  %780 = vmatprep.mubr.f32.mxu1 (!%p241_p9), %v1570_v0  ;;  %310 = vst.msk [vmem:[#allocation2 + $0x18] sm:$0xff] (!%p241_p9), %vm309_vm2, %v1570_v0  ;;  %s1573_s23 = smov (!%p241_p9), 126   ;;  %s1574_s29 = smov (!%p241_p9), 98   ;;  %v315_v14 = vld [vmem:[%s1838_s6] sm:$0xff] (!%p241_p9)  ;;  %vm458_vm6 = vcmask (!%p241_p9), 64512   ;;  %vm877_vm7 = vcmask (!%p241_p9), 1031168  }
  0x10   : > { %1504 = vset.pattern.permute.xlu1 (!%p241_p9), %v1571_v1  ;;  %s1575_s8 = smov (!%p241_p9), 32   ;;  %s1576_s9 = smov (!%p241_p9), 96   ;;  %v314_v15 = vld [vmem:[%s1836_s4] sm:$0xff] (!%p241_p9)  ;;  %v278_v17 = vand.u32 (!%p241_p9), 127, %v277_v16  ;;  %v1402_v43 = vld [vmem:[%s1835_s3 + $0x28] sm:$0xff] (!%p241_p9)  ;;  %vm453_vm10 = vcmask (!%p241_p9), 261120  }
  0x11   : > { %s1577_s13 = smov (!%p241_p9), 34   ;;  %s1578_s14 = smov (!%p241_p9), 94   ;;  %v1401_v34 = vld [vmem:[%s1835_s3 + $0x20] sm:$0xff] (!%p241_p9)  ;;  %vm966_vm11 = vcmask (!%p241_p9), 801792   ;;  %v1398_v47 = vld [vmem:[%s1835_s3 + $0x8] sm:$0xff] (!%p241_p9)  ;;  %v1403_v53 = vld [vmem:[%s1835_s3 + $0x30] sm:$0xff] (!%p241_p9) }
  0x12   : > { %v279_v18 = vadd.s32 (!%p241_p9), 128, %v278_v17  ;;  %v284_v22 = vand.u32 (!%p241_p9), 15, %v278_v17  ;;  %vm1055_vm12 = vcmask (!%p241_p9), 785408   ;;  %v316_v57 = vld [vmem:[%s1835_s3] sm:$0xff] (!%p241_p9)  ;;  %v1404_v63 = vld [vmem:[%s1835_s3 + $0x38] sm:$0xff] (!%p241_p9)  ;;  %vm617_vm13 = vcmask (!%p241_p9), 244736  }
  0x13   : > { %vm1142_vm14 = vcmask (!%p241_p9), 769024  }
  0x14   : > { %v291_v19 = vand.u32 (!%p241_p9), 15, %v279_v18  ;;  %vm1701_vm5 = vcmp.ge.s32.totalorder (!%p241_p9), %v284_v22, 2  ;;  %vm1720_vm9 = vcmp.le.s32.totalorder (!%p241_p9), %v284_v22, 13  ;;  %v312_v22 = vld [vmem:[%s1837_s5] sm:$0xff] (!%p241_p9) }
  0x15   : > { %s273_s15 = scalar_select %p272_p10, %s1642_s28, 1 }
  0x16   : > { %v867_v13 = vld [vmem:[#allocation2 + $0x18] sm:$0xff]  ;;  %vm1695_vm4 = vcmp.ge.s32.totalorder %v291_v19, 2  ;;  %vm1715_vm8 = vcmp.le.s32.totalorder %v291_v19, 13 }
  0x17   : > { %s1436_s16 = sshll.u32 %s273_s15, 3  ;;  %s1579_s15 = smov 30  }
  0x18   : > { %s276_s19 = scalar_lea.vmem %s1832_s0, %s1436_s16 }
  0x19   : > { %v333_v3 = vld [vmem:[%s276_s19] sm:$0xff] }
  0x1a   : > { %v340_v4 = vcombine.high %v333_v3, %v333_v3 }
  0x1c   : > { %1406 = vmatprep.subr.msk.mxu0 %vm345_vm0, %v340_v4 }
  0x1d   : > { %1407 = vmatpush1.msk.msra.mxu0 %vm345_vm0, %v333_v3 }
  0x1e   : > { %1408 = vmatmul.mubr.msk.f32.vlgmr.msra.gmra.mrb[0].mxu0 %vm341_vm1, %v311_v5 }
  0x1f   : > { %526 = vmatprep.mubr.f32.mxu0 %v1570_v0 }
  0x8e   : > { %v337_v6 = vpop.permute.xlu0 %336 }
  0xf1   : > { %v416_v7 = vpop.f32.mrb[0].mxu0 }
  0xf2   : > { %v417_v8 = vadd.f32 %v416_v7, %v337_v6  ;;  %v418_v9 = vpop.f32.mrb[1].mxu0 }
  0xf3   : > { %v419_v10 = vadd.f32 %v418_v9, %v337_v6  ;;  %v1405_v9 = vld [vmem:[%s1835_s3 + $0x40] sm:$0xff] }
  0xf4   : > { %v421_v11 = vmax.f32 %v417_v8, 0.0  ;;  %v1399_v8 = vld [vmem:[%s1835_s3 + $0x10] sm:$0xff] }
  0xf5   : > { %v422_v12 = vmax.f32 %v419_v10, 0.0 }
  0xf6   : > { %702 = vrot.lane.b32.xlu0 %v421_v11, %s1572_s22 }
  0xf7   : > { %704 = vrot.lane.b32.xlu1 %v422_v12, %s1572_s22 }
  0xfa   : > { %871 = vrot.lane.b32.xlu0 %v421_v11, %s1573_s23 }
  0xfb   : > { %700 = vrot.lane.b32.xlu1 %v1570_v0, %s1572_s22 }
  0xfe   : > { %964 = vrot.lane.b32.xlu0 %v867_v13, %s1574_s29 }
  0xff   : > { %875 = vrot.lane.b32.xlu1 %v867_v13, %s1573_s23 }
 0x102   : > { %960 = vrot.lane.b32.xlu0 %v421_v11, %s1574_s29 }
 0x103   : > { %449 = vrot.lane.b32.xlu1 %v421_v11, %s1575_s8 }
 0x106   : > { %873 = vrot.lane.b32.xlu0 %v422_v12, %s1573_s23 }
 0x107   : > { %447 = vrot.lane.b32.xlu1 %v1570_v0, %s1575_s8 }
 0x10a   : > { %1053 = vrot.lane.b32.xlu0 %v867_v13, %s1576_s9 }
 0x10b   : > { %437 = vrot.lane.b32.xlu1 %v421_v11, %s1577_s13 }
 0x10e   : > { %451 = vrot.lane.b32.xlu0 %v422_v12, %s1575_s8 }
 0x10f   : > { %962 = vrot.lane.b32.xlu1 %v422_v12, %s1574_s29 }
 0x112   : > { %1049 = vrot.lane.b32.xlu0 %v421_v11, %s1576_s9 }
 0x113   : > { %435 = vrot.lane.b32.xlu1 %v1570_v0, %s1577_s13 }
 0x116   : > { %439 = vrot.lane.b32.xlu0 %v422_v12, %s1577_s13 }
 0x117   : > { %1051 = vrot.lane.b32.xlu1 %v422_v12, %s1576_s9  ;;  %s269_s9 = sand.u32 1, %s1560_s25  }
 0x118   : > { %s1395_s13 = sshll.u32 %s269_s9, 4  ;;  %s1318_s20 = scalar_lea.sflag [#allocation4], %s269_s9 }
 0x11a   : > { %1140 = vrot.lane.b32.xlu0 %v867_v13, %s1578_s14 }
 0x11b   : > { %613 = vrot.lane.b32.xlu1 %v421_v11, %s1579_s15 }
 0x11e   : > { %615 = vrot.lane.b32.xlu0 %v422_v12, %s1579_s15 }
 0x11f   : > { %1138 = vrot.lane.b32.xlu1 %v422_v12, %s1578_s14 }
 0x122   : > { %1136 = vrot.lane.b32.xlu0 %v421_v11, %s1578_s14  ;;  %s1437_s14 = sshll.u32 %s1642_s28, 8  ;;  %s1580_s28 = smov [#allocation3]  }
 0x123   : > { %611 = vrot.lane.b32.xlu1 %v1570_v0, %s1579_s15  ;;  %s271_s15 = scalar_lea.vmem [#allocation3], %s1395_s13  ;;  %s1790_s19 = scalar_lea.hbm %s1839_s7, %s1437_s14 }
 0x124   : > { %s1332_s16 = sshll.u32 %s271_s15, 4  ;;  %s1510_s22 = sshll.u32 %s1580_s28, 4  ;;  %s1792_s16 = int_to_ptr.vmem [resolvable:$true] %s1332_s16  ;;  %s1511_s22 = int_to_ptr.vmem [resolvable:$false] %s1510_s22 }
 0x125   : > { %s1506_s21 = scalar_lea.vmem %s1792_s16, 256  ;;  %s1512_s23 = scalar_lea.vmem %s1511_s22, 512 }
 0x126   : > { %1236 = vperm.xlu0 %1503, %v315_v14   ;;  %p1507_p11 = scmp.ne.s32.totalorder %s1792_s16, %s1506_s21  ;;  %p1513_p0 = scmp.lt.s32.totalorder %s1792_s16, %s1511_s22 }
 0x127   : > { %1227 = vperm.xlu1 %1504, %v314_v15   ;;  %p1514_p1 = scmp.lt.s32.totalorder %s1512_s23, %s1506_s21 }
 0x128   : > { %p1508_p12 = pnand %p1507_p11, %p1659_p5 }
 0x129   : > { %p1515_p2 = por %p1514_p1, %p1513_p0 }
 0x12a   : > { %p1509_p13 = pneg %p1508_p12 }
 0x12c   : > { %p1516_p3 = pnand %p1515_p2, %p1509_p13 }
 0x168   : > { %v703_v20 = vpop.permute.xlu0 %702 }
 0x169   : > { %v705_v23 = vpop.permute.xlu1 %704 }
 0x16a   : > { %v708_v24 = vsel %vm706_vm3, %v703_v20, %v705_v23 }
 0x16b   : > { %1416 = vmatprep.subr.msk.mxu1 %vm1695_vm4, %v708_v24 }
 0x16c   : > { %v872_v25 = vpop.permute.xlu0 %871 }
 0x16d   : > { %v701_v27 = vpop.permute.xlu1 %700 }
 0x16e   : > { %v707_v29 = vsel %vm706_vm3, %v701_v27, %v703_v20 }
 0x16f   : > { %1417 = vmatpush1.msk.msra.mxu1 %vm1701_vm5, %v707_v29 }
 0x170   : > { %1418 = vmatmul.mubr.msk.f32.vlgmr.msra.gmra.mrb[0].mxu1 %vm458_vm6, %v1400_v28  ;;  %792 = vmatprep.subr.mxu1 %v422_v12  ;;  %v965_v30 = vpop.permute.xlu0 %964 }
 0x171   : > { %v876_v31 = vpop.permute.xlu1 %875  ;;  %793 = vmatpush1.msra.mxu1 %v421_v11  ;;  %856 = vmatprep.mubr.f32.mxu1 %v1570_v0 }
 0x174   : > { %v961_v32 = vpop.permute.xlu0 %960 }
 0x175   : > { %v450_v33 = vpop.permute.xlu1 %449 }
 0x178   : > { %1419 = vmatmul.mubr.msk.f32.vlgmr.msra.gmra.mrb[0].mxu1 %vm458_vm6, %v1401_v34  ;;  %v874_v36 = vpop.permute.xlu0 %873 }
 0x179   : > { %v878_v38 = vsel %vm877_vm7, %v872_v25, %v874_v36  ;;  %v879_v39 = vsel %vm877_vm7, %v874_v36, %v876_v31  ;;  %v448_v40 = vpop.permute.xlu1 %447  ;;  %951 = vmatprep.mubr.f32.mxu1 %v1570_v0 }
 0x17a   : > { %1420 = vmatprep.subr.msk.mxu1 %vm1715_vm8, %v879_v39  ;;  %v454_v48 = vsel %vm453_vm10, %v448_v40, %v450_v33 }
 0x17b   : > { %1421 = vmatpush1.msk.msra.mxu1 %vm1720_vm9, %v878_v38 }
 0x17c   : > { %v1054_v41 = vpop.permute.xlu0 %1053 }
 0x17d   : > { %v438_v42 = vpop.permute.xlu1 %437 }
 0x180   : > { %1422 = vmatmul.mubr.msk.f32.vlgmr.msra.gmra.mrb[0].mxu1 %vm458_vm6, %v1402_v43  ;;  %v452_v44 = vpop.permute.xlu0 %451 }
 0x181   : > { %v963_v45 = vpop.permute.xlu1 %962  ;;  %v455_v46 = vsel %vm453_vm10, %v450_v33, %v452_v44  ;;  %1040 = vmatprep.mubr.f32.mxu1 %v1570_v0 }
 0x182   : > { %v967_v49 = vsel %vm966_vm11, %v961_v32, %v963_v45  ;;  %v968_v50 = vsel %vm966_vm11, %v963_v45, %v965_v30  ;;  %462 = vmatprep.subr.mxu0 %v455_v46 }
 0x183   : > { %463 = vmatpush1.msra.mxu0 %v454_v48  ;;  %1423 = vmatprep.subr.msk.mxu1 %vm1695_vm4, %v968_v50 }
 0x184   : > { %1424 = vmatpush1.msk.msra.mxu1 %vm1701_vm5, %v967_v49  ;;  %v1050_v51 = vpop.permute.xlu0 %1049  ;;  %1409 = vmatmul.mubr.msk.f32.vlgmr.msra.gmra.mrb[2].mxu0 %vm458_vm6, %v1398_v47 }
 0x185   : > { %v436_v52 = vpop.permute.xlu1 %435  ;;  %600 = vmatprep.mubr.f32.mxu0 %v1570_v0 }
 0x186   : > { %v441_v58 = vsel %vm309_vm2, %v436_v52, %v438_v42 }
 0x188   : > { %1425 = vmatmul.mubr.msk.f32.vlgmr.msra.gmra.mrb[0].mxu1 %vm458_vm6, %v1403_v53  ;;  %v440_v54 = vpop.permute.xlu0 %439 }
 0x189   : > { %v442_v55 = vsel %vm309_vm2, %v438_v42, %v440_v54  ;;  %v1052_v56 = vpop.permute.xlu1 %1051  ;;  %1127 = vmatprep.mubr.f32.mxu1 %v1570_v0 }
 0x18a   : > { %v1056_v59 = vsel %vm1055_vm12, %v1050_v51, %v1052_v56  ;;  %1410 = vmatprep.subr.msk.mxu0 %vm1695_vm4, %v442_v55  ;;  %v1057_v60 = vsel %vm1055_vm12, %v1052_v56, %v1054_v41 }
 0x18b   : > { %1411 = vmatpush1.msk.msra.mxu0 %vm1701_vm5, %v441_v58  ;;  %1063 = vmatprep.subr.mxu1 %v1057_v60 }
 0x18c   : > { %1064 = vmatpush1.msra.mxu1 %v1056_v59  ;;  %v1141_v61 = vpop.permute.xlu0 %1140  ;;  %1412 = vmatmul.mubr.msk.f32.vlgmr.msra.gmra.mrb[2].mxu0 %vm458_vm6, %v316_v57 }
 0x18d   : > { %v614_v62 = vpop.permute.xlu1 %613  ;;  %691 = vmatprep.mubr.f32.mxu0 %v1570_v0 }
 0x190   : > { %1426 = vmatmul.mubr.msk.f32.vlgmr.msra.gmra.mrb[0].mxu1 %vm458_vm6, %v1404_v63  ;;  %v616_v1 = vpop.permute.xlu0 %615 }
 0x191   : > { %v619_v2 = vsel %vm617_vm13, %v614_v62, %v616_v1  ;;  %v1139_v3 = vpop.permute.xlu1 %1138  ;;  %1216 = vmatprep.mubr.f32.mxu1 %v1570_v0 }
 0x192   : > { %v1144_v4 = vsel %vm1142_vm14, %v1139_v3, %v1141_v61  ;;  %1413 = vmatprep.subr.msk.mxu0 %vm1715_vm8, %v619_v2 }
 0x193   : > { %1427 = vmatprep.subr.msk.mxu1 %vm1715_vm8, %v1144_v4 }
 0x194   : > { %v1137_v5 = vpop.permute.xlu0 %1136 }
 0x195   : > { %v1143_v6 = vsel %vm1142_vm14, %v1137_v5, %v1139_v3  ;;  %v612_v7 = vpop.permute.xlu1 %611 }
 0x196   : > { %v618_v10 = vsel %vm617_vm13, %v612_v7, %v614_v62  ;;  %1428 = vmatpush1.msk.msra.mxu1 %vm1720_vm9, %v1143_v6 }
 0x197   : > { %1414 = vmatpush1.msk.msra.mxu0 %vm1720_vm9, %v618_v10 }
 0x198   : > { %1415 = vmatmul.mubr.msk.f32.vlgmr.msra.gmra.mrb[2].mxu0 %vm458_vm6, %v1399_v8  ;;  %1429 = vmatmul.mubr.msk.f32.vlgmr.msra.gmra.mrb[0].mxu1 %vm458_vm6, %v1405_v9 }
 0x199   : > { %1306 = vmatprep.mubr.f32.mxu0 %v1570_v0 }
 0x1a5   : > { %v1237_v0 = vpop.permute.xlu0 %1236 }
 0x1a6   : > { %v1228_v11 = vpop.permute.xlu1 %1227 }
 0x26b   : > { %v693_v12 = vpop.f32.mrb[2].mxu0  ;;  %v1218_v13 = vpop.f32.mrb[0].mxu1 }
 0x26c   : > { %v1438_v14 = vadd.f32 %v1218_v13, %v693_v12  ;;  %v695_v15 = vpop.f32.mrb[3].mxu0  ;;  %v1220_v16 = vpop.f32.mrb[1].mxu1 }
 0x26d   : > { %v1439_v17 = vadd.f32 %v1220_v16, %v695_v15 }
 0x26e   : > { %v1230_v18 = vadd.f32 %v1438_v14, %v1228_v11 }
 0x26f   : > { %v1231_v19 = vadd.f32 %v1439_v17, %v1228_v11 }
 0x270   : > { %v1232_v21 = vmax.f32 %v1230_v18, 0.0 }
 0x271   : > { %v1233_v20 = vmax.f32 %v1231_v19, 0.0 }
 0x273   : > { %1242 = vmatprep.subr.mxu0 %v1233_v20 }
 0x274   : > { %1243 = vmatpush1.msra.mxu0 %v1232_v21 }
 0x275   : > { %1430 = vmatmul.mubr.msk.f32.vlgmr.msra.gmra.mrb[4].mxu0 %vm458_vm6, %v312_v22 }
 0x348   : > { %v1308_v23 = vpop.f32.mrb[4].mxu0 }
 0x349   : > { %v1309_v24 = vadd.f32 %v1308_v23, %v1237_v0  ;;  %v1310_v25 = vpop.f32.mrb[5].mxu0 }
 0x34a   : > { %v1311_v26 = vadd.f32 %v1310_v25, %v1237_v0 }
 0x34b   : > { %v1313_v27 = vmax.f32 %v1309_v24, 0.0 }
 0x34c   : > { %v1314_v28 = vmax.f32 %v1311_v26, 0.0 }
 0x34d   : > { %1315 = vst [vmem:[%s271_s15] sm:$0xff] %v1313_v27 }
 0x34e   : > { %1316 = vst [vmem:[%s271_s15 + $0x8] sm:$0xff] %v1314_v28 }
 0x34f   : > { %1519 = shalt.err (!%p1516_p3)
}
 0x350   : > { %s1520_s29 = scalar_lea.hbm %s1790_s19, 256  ;;  %s1524_s13 = scalar_lea.hbm %s1839_s7, 512 }
 0x351   : > { %p1521_p4 = scmp.ne.s32.totalorder %s1790_s19, %s1520_s29  ;;  %p1525_p9 = scmp.lt.u32.totalorder %s1790_s19, %s1839_s7 }
 0x352   : > { %p1526_p10 = scmp.lt.u32.totalorder %s1524_s13, %s1520_s29  ;;  %p1528_p12 = scmp.lt.u32.totalorder %s1520_s29, %s1790_s19 }
 0x353   : > { %p1522_p7 = pnand %p1521_p4, %p1659_p5 }
 0x354   : > { %p1527_p11 = por %p1526_p10, %p1525_p9 }
 0x355   : > { %p1523_p8 = pneg %p1522_p7 }
 0x356   : > { %p1529_p13 = por %p1528_p12, %p1527_p11 }
 0x358   : > { %p1530_p0 = pnand %p1529_p13, %p1523_p8 }
 0x35a   : > { %1533 = shalt.err (!%p1530_p0)
}
 0x35b   : > { %1454 = dma.vmem_to_hbm [thread:$0]  (%p1659_p5), %s1792_s16, 256, %s1790_s19, %s1318_s20  }
 0x35c PF: > { %p1460_p1 = scmp.ge.s32.totalorder %s1568_s27, 2  ;;  %s1344_s17 = sand.u32 1, %s1556_s24  }
 0x35d   : > { %s1345_s18 = scalar_lea.sflag [#allocation4], %s1344_s17 }
 0x35e   : > { %p1457_p2 = pnand %p1460_p1, %p1663_p6 }
 0x360   : > { %1551 = dma.done.wait (!%p1457_p2), %s1345_s18, 256  }
 0x361   : > { %1553 = vsyncadd (!%p1457_p2), %s1345_s18, 4294967040  ;;  %p17_p3 = scmp.ge.s32.totalorder %s1646_s30, 4   ;;  %s1850_s24 = smov %s1560_s25 }
 0x362   : > { %s1851_s25 = smov %s1564_s26  ;;  %s1852_s26 = smov %s1657_s10 }
 0x363   : > { %s1853_s27 = smov %s1646_s30  ;;  %19 = sbr.rel (!%p17_p3) target bundleno = 3 (0x3), region = 91 }
 0x36a   :  { %1350 = vsyncpa [#allocation4], 1 }
 0x36b   :  { %1352 = vsyncpa [#allocation4 + $0x1], 1 }

</bundles_post_ra>
